<compile_context>
chip_gen: v7x
topology: tpu7x:2x2x1
jax: 0.10.0
libtpu: 0.0.40
codegen_flags: <defaults>
</compile_context>

<pallas_src>
import math

import jax
import jax.numpy as jnp
from jax.experimental import pallas as pl
from jax.experimental.pallas import tpu as pltpu


# -----------------------------------------------------------------------------
# Tile-size helpers
# -----------------------------------------------------------------------------
def _pick_tm(M, cap=512):
    """Largest row tile <= cap that divides M (multiple of 8); prefer >=2 grid
    steps so both v7x TensorCores get work.  Callers row-pad awkward M to a
    multiple of 8 first, so the TM=M fallback only triggers for tiny M (< 8)."""
    for cand in (512, 256, 128, 64, 32, 16, 8):
        if cand <= cap and M % cand == 0:
            tm = cand
            break
    else:
        return M  # tiny M (< 8): single small tile
    if M // tm == 1 and tm >= 16:
        tm //= 2  # split so a second TensorCore has a grid step
    return tm


def _pick_tc(C):
    """Channel tile for the depthwise kernel.  A lane tile that is not the
    full channel dim must be a multiple of 128 (TPU lane tiling); fall back to
    the whole channel dim when no such divisor exists."""
    if C <= 512:
        return C
    for tc in (512, 384, 256, 128):
        if C % tc == 0:
            return tc
    return C


# -----------------------------------------------------------------------------
# Pallas kernels
# -----------------------------------------------------------------------------
def matmul_bias_act(a, b, bias, *, act=None, out_dtype=jnp.bfloat16):
    """out = act(a @ b + bias).  a:(M,K) f32/bf16, b:(K,N) bf16, bias:(N,) f32.

    MXU runs in bf16 with fp32 accumulation; the bias/SiLU epilogue stays
    fp32; the result is stored in `out_dtype` (bf16 between layers to halve
    HBM traffic, fp32 for the final logits).
    """
    M, K = a.shape
    Nout = b.shape[1]
    if b.dtype != jnp.bfloat16:
        b = b.astype(jnp.bfloat16)
    # Row-pad awkward M (not a multiple of 8) instead of falling back to one
    # giant TM=M tile; padded rows are zeros and sliced off below.
    Mp = M
    if M > 8 and M % 8 != 0:
        Mp = ((M + 255) // 256) * 256
        a = jnp.pad(a, ((0, Mp - M), (0, 0)))
    TM = _pick_tm(Mp)
    grid = (Mp // TM,)
    bias2 = bias.reshape(1, Nout)

    def kernel(a_ref, b_ref, bias_ref, o_ref):
        a_val = a_ref[...]
        if a_val.dtype != jnp.bfloat16:
            a_val = a_val.astype(jnp.bfloat16)  # bf16-native MXU
        acc = jnp.dot(a_val, b_ref[...], preferred_element_type=jnp.float32)
        acc = acc + bias_ref[...]
        if act == "silu":
            acc = acc * jax.nn.sigmoid(acc)
        o_ref[...] = acc.astype(o_ref.dtype)

    # TODO(synk): add an output-channel grid axis (TN multiple of 128) for the
    #             small-M late-stage matmuls so both v7x TensorCores split the
    #             weight DMA.
    out = pl.pallas_call(
        kernel,
        out_shape=jax.ShapeDtypeStruct((Mp, Nout), out_dtype),
        grid=grid,
        in_specs=[
            pl.BlockSpec((TM, K), lambda i: (i, 0)),
            pl.BlockSpec((K, Nout), lambda i: (0, 0)),
            pl.BlockSpec((1, Nout), lambda i: (0, 0)),
        ],
        out_specs=pl.BlockSpec((TM, Nout), lambda i: (i, 0)),
        compiler_params=pltpu.CompilerParams(dimension_semantics=("parallel",)),
    )(a, b, bias2)
    return out if Mp == M else out[:M]


def depthwise_conv_bn_silu(x, w, bias, *, stride, out_dtype=jnp.bfloat16):
    """Depthwise KxK conv + folded-BN bias + SiLU, fused with SE pooling.

    x: (N, H, W, C) NHWC (f32 or bf16), w: (k, k, C) fp32 (BN scale folded),
    bias: (C,) fp32.  Returns
        y      : (N, Ho, Wo, C) `out_dtype`  -- SiLU(depthwise(x) + bias)
        pooled : (N, C) fp32                 -- spatial mean of y (SE squeeze)

    Strided (stride=2) convs are handled by decomposing the padded input into
    s*s polyphase tensors at the XLA level (strided slices only at the XLA
    boundary, no data duplication); inside the kernel every tap is a
    contiguous static slice, so there are no strided / gather / integer ref
    reads at all.
    """
    N, H, W, C = x.shape
    k = w.shape[0]
    s = stride
    pad = ((s - 1) + (k - 1)) // 2  # timm get_padding, dilation=1
    Ho = (H + 2 * pad - k) // s + 1
    Wo = (W + 2 * pad - k) // s + 1
    off = (k - 1) // s              # max per-phase tap offset
    Hph, Wph = Ho + off, Wo + off   # rows/cols needed from each phase
    # Pad so every polyphase slice has exactly (Hph, Wph) rows/cols.
    pad_b = max(0, s * Hph - H - pad)
    pad_r = max(0, s * Wph - W - pad)
    xp = jnp.pad(x, ((0, 0), (pad, pad_b), (pad, pad_r), (0, 0)))
    phases = [xp[:, py::s, px::s, :] for py in range(s) for px in range(s)]
    num_ph = s * s

    TC = _pick_tc(C)
    grid = (N, C // TC)
    w_flat = w.reshape(k * k, C).astype(jnp.float32)
    bias2 = bias.reshape(1, C)
    inv_hw = 1.0 / (Ho * Wo)

    def kernel(*refs):
        ph_refs = refs[:num_ph]
        w_ref, b_ref, o_ref, p_ref = refs[num_ph:]
        w_all = w_ref[...]  # (k*k, TC); indexed as a value (never int-index a ref)
        acc = jnp.zeros((Ho, Wo, TC), jnp.float32)
        for dy in range(k):
            for dx in range(k):
                ph = ph_refs[(dy % s) * s + (dx % s)]
                tap = ph[dy // s : dy // s + Ho, dx // s : dx // s + Wo, :]
                acc = acc + tap.astype(jnp.float32) * w_all[dy * k + dx]
        acc = acc + b_ref[...]
        acc = acc * jax.nn.sigmoid(acc)          # SiLU, fp32 epilogue
        o_ref[...] = acc.astype(o_ref.dtype)     # bf16 activation out
        # SE squeeze fused here: per-(n, channel-tile) spatial mean of the
        # activated output, so SE never re-reads the wide activation from HBM.
        p_ref[...] = (jnp.sum(acc, axis=(0, 1)) * inv_hw).reshape(1, TC)

    # TODO(synk): at real 260x260 resolution, row-tile the spatial dim with a
    #             halo (and accumulate the pooled sum across row steps) so the
    #             per-step block fits v7x's smaller VMEM budget.
    in_specs = [
        pl.BlockSpec((None, Hph, Wph, TC), lambda n, c: (n, 0, 0, c))
        for _ in range(num_ph)
    ]
    in_specs += [
        pl.BlockSpec((k * k, TC), lambda n, c: (0, c)),
        pl.BlockSpec((1, TC), lambda n, c: (0, c)),
    ]
    y, pooled = pl.pallas_call(
        kernel,
        out_shape=(
            jax.ShapeDtypeStruct((N, Ho, Wo, C), out_dtype),
            jax.ShapeDtypeStruct((N, C), jnp.float32),
        ),
        grid=grid,
        in_specs=in_specs,
        out_specs=(
            pl.BlockSpec((None, Ho, Wo, TC), lambda n, c: (n, 0, 0, c)),
            pl.BlockSpec((1, TC), lambda n, c: (n, c)),
        ),
        compiler_params=pltpu.CompilerParams(
            dimension_semantics=("parallel", "parallel")
        ),
    )(*phases, w_flat, bias2)
    return y, pooled


def se_gate(pooled, w1, b1, w2, b2):
    """SE excitation on the pre-pooled (N, C) tensor:
       gate = sigmoid(W2 @ silu(W1 @ pooled + b1) + b2)."""
    N, C = pooled.shape
    Cr = w1.shape[1]

    def kernel(p_ref, w1_ref, b1_ref, w2_ref, b2_ref, o_ref):
        t = jnp.dot(p_ref[...], w1_ref[...], preferred_element_type=jnp.float32)
        t = t + b1_ref[...]
        t = t * jax.nn.sigmoid(t)
        g = jnp.dot(t, w2_ref[...], preferred_element_type=jnp.float32)
        o_ref[...] = jax.nn.sigmoid(g + b2_ref[...])

    return pl.pallas_call(
        kernel,
        out_shape=jax.ShapeDtypeStruct((N, C), jnp.float32),
        grid=(1,),
        in_specs=[
            pl.BlockSpec((N, C), lambda i: (0, 0)),
            pl.BlockSpec((C, Cr), lambda i: (0, 0)),
            pl.BlockSpec((1, Cr), lambda i: (0, 0)),
            pl.BlockSpec((Cr, C), lambda i: (0, 0)),
            pl.BlockSpec((1, C), lambda i: (0, 0)),
        ],
        out_specs=pl.BlockSpec((N, C), lambda i: (0, 0)),
        compiler_params=pltpu.CompilerParams(dimension_semantics=("arbitrary",)),
    )(pooled, w1, b1.reshape(1, Cr), w2, b2.reshape(1, C))


def se_project(x, gate, w, bias, *, residual=None, out_dtype=jnp.bfloat16):
    """out = (x * gate) @ w + bias [+ residual]   (no activation).

    x: (N,H,W,Cm) bf16, gate: (N,Cm) f32, w: (Cm,Cout) bf16, bias: (Cout,),
    residual: (N,H,W,Cout) or None.  Fuses the SE channel scale, the 1x1
    projection conv (folded BN) and the skip connection into one kernel.
    """
    N, H, W, Cm = x.shape
    Cout = w.shape[1]
    if w.dtype != jnp.bfloat16:
        w = w.astype(jnp.bfloat16)
    HW = H * W
    xf = x.reshape(N, HW, Cm)
    TM = _pick_tm(HW)
    grid = (N, HW // TM)
    bias2 = bias.reshape(1, Cout)

    def kernel(*refs):
        if residual is None:
            x_ref, g_ref, w_ref, b_ref, o_ref = refs
            r_ref = None
        else:
            x_ref, g_ref, w_ref, b_ref, r_ref, o_ref = refs
        a = (x_ref[...].astype(jnp.float32) * g_ref[...]).astype(jnp.bfloat16)
        acc = jnp.dot(a, w_ref[...], preferred_element_type=jnp.float32)
        acc = acc + b_ref[...]
        if r_ref is not None:
            acc = acc + r_ref[...].astype(jnp.float32)
        o_ref[...] = acc.astype(o_ref.dtype)

    in_specs = [
        pl.BlockSpec((None, TM, Cm), lambda n, i: (n, i, 0)),
        pl.BlockSpec((1, Cm), lambda n, i: (n, 0)),
        pl.BlockSpec((Cm, Cout), lambda n, i: (0, 0)),
        pl.BlockSpec((1, Cout), lambda n, i: (0, 0)),
    ]
    args = [xf, gate, w, bias2]
    if residual is not None:
        in_specs.append(pl.BlockSpec((None, TM, Cout), lambda n, i: (n, i, 0)))
        args.append(residual.reshape(N, HW, Cout))

    out = pl.pallas_call(
        kernel,
        out_shape=jax.ShapeDtypeStruct((N, HW, Cout), out_dtype),
        grid=grid,
        in_specs=in_specs,
        out_specs=pl.BlockSpec((None, TM, Cout), lambda n, i: (n, i, 0)),
        compiler_params=pltpu.CompilerParams(
            dimension_semantics=("parallel", "parallel")
        ),
    )(*args)
    return out.reshape(N, H, W, Cout)


def global_avg_pool(x):
    """(N, H, W, C) -> (N, C) spatial mean with fp32 accumulation."""
    N, H, W, C = x.shape
    HW = H * W
    xf = x.reshape(N, HW, C)
    inv_hw = 1.0 / HW

    def kernel(x_ref, o_ref):
        o_ref[...] = (
            jnp.sum(x_ref[...].astype(jnp.float32), axis=0, keepdims=True) * inv_hw
        )

    return pl.pallas_call(
        kernel,
        out_shape=jax.ShapeDtypeStruct((N, C), jnp.float32),
        grid=(N,),
        in_specs=[pl.BlockSpec((None, HW, C), lambda n: (n, 0, 0))],
        out_specs=pl.BlockSpec((1, C), lambda n: (n, 0)),
        compiler_params=pltpu.CompilerParams(dimension_semantics=("parallel",)),
    )(xf)


# -----------------------------------------------------------------------------
# Glue: conv helpers / blocks / full forward
# -----------------------------------------------------------------------------
def conv_stem(x, w_mat, bias, *, k=3, stride=2):
    """3x3 s2 stem conv via im2col (XLA glue, bf16 patches) + Pallas matmul
    with fused folded-BN bias + SiLU.
    # TODO(synk): replace the XLA im2col with a Pallas stencil stem kernel to
    #             avoid the k*k HBM expansion of the largest-spatial tensor.
    """
    N, H, W, Cin = x.shape
    pad = ((stride - 1) + (k - 1)) // 2
    xp = jnp.pad(x, ((0, 0), (pad, pad), (pad, pad), (0, 0)))
    Ho = (H + 2 * pad - k) // stride + 1
    Wo = (W + 2 * pad - k) // stride + 1
    cols = []
    for dy in range(k):
        for dx in range(k):
            cols.append(
                xp[
                    :,
                    dy : dy + stride * (Ho - 1) + 1 : stride,
                    dx : dx + stride * (Wo - 1) + 1 : stride,
                    :,
                ]
            )
    patches = (
        jnp.concatenate(cols, axis=-1)
        .reshape(N * Ho * Wo, k * k * Cin)
        .astype(jnp.bfloat16)
    )
    out = matmul_bias_act(patches, w_mat, bias, act="silu")
    return out.reshape(N, Ho, Wo, -1)


def mb_block(x, p):
    """DepthwiseSeparable / InvertedResidual block (timm ordering, eval mode)."""
    shortcut = x
    N, H, W, Cin = x.shape
    if "pw_exp_w" in p:  # InvertedResidual: 1x1 expand + BN + SiLU
        xf = x.reshape(N * H * W, Cin)
        x = matmul_bias_act(xf, p["pw_exp_w"], p["pw_exp_b"], act="silu")
        x = x.reshape(N, H, W, -1)
    # Depthwise conv + BN + SiLU, with the SE spatial pooling fused in.
    x, pooled = depthwise_conv_bn_silu(x, p["dw_w"], p["dw_b"], stride=p["stride"])
    gate = se_gate(pooled, p["se_w1"], p["se_b1"], p["se_w2"], p["se_b2"])
    res = shortcut if p["has_skip"] else None
    # SE gate + projection 1x1 conv + residual add fused in one kernel.
    return se_project(x, gate, p["pw_w"], p["pw_b"], residual=res)


def efficientnet_b2_forward(x_nchw, params):
    # NCHW (PyTorch) -> NHWC (kernel layout)
    x = jnp.transpose(x_nchw, (0, 2, 3, 1)).astype(jnp.float32)
    x = conv_stem(x, params["stem_w"], params["stem_b"], k=3, stride=2)
    for bp in params["blocks"]:
        x = mb_block(x, bp)
    N, H, W, C = x.shape
    x = matmul_bias_act(
        x.reshape(N * H * W, C), params["head_w"], params["head_b"], act="silu"
    ).reshape(N, H, W, -1)
    x = global_avg_pool(x)  # (N, 1408) fp32
    # Classifier: lane-dense padded output (1000 -> 1024), sliced afterwards.
    logits = matmul_bias_act(
        x, params["fc_w"], params["fc_b"], act=None, out_dtype=jnp.float32
    )
    return logits[:, : params["num_classes"]]  # (N, num_classes)


# -----------------------------------------------------------------------------
# Deterministic synthetic parameters (EfficientNet-B2 geometry)
# -----------------------------------------------------------------------------
class KeyGen:
    def __init__(self, key):
        self.key = key
        self.i = 0

    def __call__(self):
        self.i += 1
        return jax.random.fold_in(self.key, self.i)


def init_conv(kg, shape):
    fan_in = int(math.prod(shape[:-1]))
    return jax.random.normal(kg(), shape, dtype=jnp.float32) / math.sqrt(fan_in)


def init_bn(kg, c):
    """Eval-mode BatchNorm folded to (scale, bias)."""
    gamma = 1.0 + 0.1 * jax.random.normal(kg(), (c,), dtype=jnp.float32)
    beta = 0.1 * jax.random.normal(kg(), (c,), dtype=jnp.float32)
    mean = 0.1 * jax.random.normal(kg(), (c,), dtype=jnp.float32)
    var = jax.random.uniform(kg(), (c,), minval=0.5, maxval=1.5, dtype=jnp.float32)
    scale = gamma / jnp.sqrt(var + 1e-5)
    bias = beta - mean * scale
    return scale, bias


def build_params(key, num_classes=1000):
    kg = KeyGen(key)
    params = {"num_classes": num_classes}

    stem_c = 32
    w = init_conv(kg, (3, 3, 3, stem_c))
    sc, b = init_bn(kg, stem_c)
    # Matmul weights are stored bf16 (MXU-native); folding math stays fp32.
    params["stem_w"] = (w * sc).reshape(3 * 3 * 3, stem_c).astype(jnp.bfloat16)
    params["stem_b"] = b

    # EfficientNet-B2 stage config: (type, kernel, stride, expand, out_c, repeats)
    stages = [
        ("ds", 3, 1, 1, 16, 2),
        ("ir", 3, 2, 6, 24, 3),
        ("ir", 5, 2, 6, 48, 3),
        ("ir", 3, 2, 6, 88, 4),
        ("ir", 5, 1, 6, 120, 4),
        ("ir", 5, 2, 6, 208, 5),
        ("ir", 3, 1, 6, 352, 2),
    ]
    blocks = []
    in_c = stem_c
    for btype, k, s, e, out_c, reps in stages:
        for r in range(reps):
            stride = s if r == 0 else 1
            bp = {
                "type": btype,
                "k": k,
                "stride": stride,
                "has_skip": (stride == 1 and in_c == out_c),
            }
            se_c = max(1, int(in_c * 0.25))
            if btype == "ds":
                mid = in_c
            else:
                mid = in_c * e
                w_exp = init_conv(kg, (in_c, mid))
                sc, b = init_bn(kg, mid)
                bp["pw_exp_w"] = (w_exp * sc).astype(jnp.bfloat16)
                bp["pw_exp_b"] = b
            # depthwise conv (BN scale folded into weight); stays fp32 (VPU)
            w_dw = init_conv(kg, (k, k, mid))
            sc, b = init_bn(kg, mid)
            bp["dw_w"] = w_dw * sc
            bp["dw_b"] = b
            # squeeze-excite (1x1 convs with bias); tiny, kept fp32
            bp["se_w1"] = init_conv(kg, (mid, se_c))
            bp["se_b1"] = 0.01 * jax.random.normal(kg(), (se_c,), dtype=jnp.float32)
            bp["se_w2"] = init_conv(kg, (se_c, mid))
            bp["se_b2"] = 0.01 * jax.random.normal(kg(), (mid,), dtype=jnp.float32)
            # projection 1x1 (no activation)
            w_pw = init_conv(kg, (mid, out_c))
            sc, b = init_bn(kg, out_c)
            bp["pw_w"] = (w_pw * sc).astype(jnp.bfloat16)
            bp["pw_b"] = b
            blocks.append(bp)
            in_c = out_c
    params["blocks"] = blocks

    head_c = 1408
    w = init_conv(kg, (in_c, head_c))
    sc, b = init_bn(kg, head_c)
    params["head_w"] = (w * sc).astype(jnp.bfloat16)
    params["head_b"] = b

    # Classifier weights padded to a lane-dense (multiple-of-128) output width.
    nc_pad = ((num_classes + 127) // 128) * 128
    w_fc = init_conv(kg, (head_c, num_classes))
    b_fc = 0.01 * jax.random.normal(kg(), (num_classes,), dtype=jnp.float32)
    params["fc_w"] = jnp.pad(w_fc, ((0, 0), (0, nc_pad - num_classes))).astype(
        jnp.bfloat16
    )
    params["fc_b"] = jnp.pad(b_fc, (0, nc_pad - num_classes))
    return params


# -----------------------------------------------------------------------------
if __name__ == "__main__":
    key = jax.random.PRNGKey(0)
    pkey, xkey = jax.random.split(key)
    params = build_params(pkey, num_classes=1000)

    # Small image, NCHW like the PyTorch module (3 input channels, /32 friendly).
    x = jax.random.normal(xkey, (2, 3, 64, 64), dtype=jnp.float32)

    logits = efficientnet_b2_forward(x, params)
    logits = jax.block_until_ready(logits)
    assert logits.shape == (2, 1000) and logits.dtype == jnp.float32
    assert bool(jnp.all(jnp.isfinite(logits)))
    print("KERNEL_OK")
</pallas_src>

<mosaic_0001>
module attributes {stable_mosaic.version = 11 : i64} {
  func.func @kernel(%arg0: i32, %arg1: memref<512x27xbf16, #tpu.memory_space<vmem>>, %arg2: memref<27x32xbf16, #tpu.memory_space<vmem>>, %arg3: memref<1x32xf32, #tpu.memory_space<vmem>>, %arg4: memref<512x32xbf16, #tpu.memory_space<vmem>>) attributes {dimension_semantics = [#tpu.dimension_semantics<parallel>], iteration_bounds = array<i64: 4>, scalar_prefetch = 0 : i64, scratch_operands = 0 : i64, tpu.core_type = #tpu.core_type<tc>, window_params = [{transform_indices = @transform_0, window_bounds = array<i64: 512, 27>}, {pipeline_mode = #tpu.pipeline_mode<synchronous>, transform_indices = @transform_1, window_bounds = array<i64: 27, 32>}, {pipeline_mode = #tpu.pipeline_mode<synchronous>, transform_indices = @transform_2, window_bounds = array<i64: 1, 32>}, {transform_indices = @transform_3, window_bounds = array<i64: 512, 32>}]} {
    %c0 = arith.constant 0 : index
    %c0_0 = arith.constant 0 : index
    %0 = vector.load %arg1[%c0, %c0_0] : memref<512x27xbf16, #tpu.memory_space<vmem>>, vector<512x27xbf16>
    %c0_1 = arith.constant 0 : index
    %c0_2 = arith.constant 0 : index
    %1 = vector.load %arg2[%c0_1, %c0_2] : memref<27x32xbf16, #tpu.memory_space<vmem>>, vector<27x32xbf16>
    %cst = arith.constant dense<0.000000e+00> : vector<512x32xf32>
    %2 = tpu.matmul %0, %1, %cst {dimension_numbers = #tpu.dot_dimension_numbers<[1], [0], [0], [1], [0, 0, 1, 1], [], []>} : vector<512x27xbf16>, vector<27x32xbf16>, vector<512x32xf32> -> vector<512x32xf32>
    %c0_3 = arith.constant 0 : index
    %c0_4 = arith.constant 0 : index
    %3 = vector.load %arg3[%c0_3, %c0_4] : memref<1x32xf32, #tpu.memory_space<vmem>>, vector<1x32xf32>
    %4 = vector.broadcast %3 : vector<1x32xf32> to vector<512x32xf32>
    %5 = arith.addf %2, %4 : vector<512x32xf32>
    %6 = arith.negf %5 : vector<512x32xf32>
    %7 = math.exp %6 : vector<512x32xf32>
    %cst_5 = arith.constant 1.000000e+00 : f32
    %8 = vector.broadcast %cst_5 : f32 to vector<512x32xf32>
    %9 = arith.addf %8, %7 : vector<512x32xf32>
    %10 = arith.divf %8, %9 : vector<512x32xf32>
    %11 = arith.mulf %5, %10 : vector<512x32xf32>
    %12 = arith.truncf %11 : vector<512x32xf32> to vector<512x32xbf16>
    %c0_6 = arith.constant 0 : index
    %c0_7 = arith.constant 0 : index
    %13 = vector.load %arg4[%c0_6, %c0_7] : memref<512x32xbf16, #tpu.memory_space<vmem>>, vector<512x32xbf16>
    tpu.vector_store %arg4[%c0_6, %c0_7], %12 {strides = array<i32>} : memref<512x32xbf16, #tpu.memory_space<vmem>>, vector<512x32xbf16>,
    return
  }
  func.func @transform_0(%arg0: i32) -> (i32, i32) {
    %c0_i32 = arith.constant 0 : i32
    %c0_i32_0 = arith.constant 0 : i32
    return %arg0, %c0_i32 : i32, i32
  }
  func.func @transform_1(%arg0: i32) -> (i32, i32) {
    %c0_i32 = arith.constant 0 : i32
    %c0_i32_0 = arith.constant 0 : i32
    %c0_i32_1 = arith.constant 0 : i32
    return %c0_i32, %c0_i32_0 : i32, i32
  }
  func.func @transform_2(%arg0: i32) -> (i32, i32) {
    %c0_i32 = arith.constant 0 : i32
    %c0_i32_0 = arith.constant 0 : i32
    %c0_i32_1 = arith.constant 0 : i32
    return %c0_i32, %c0_i32_0 : i32, i32
  }
  func.func @transform_3(%arg0: i32) -> (i32, i32) {
    %c0_i32 = arith.constant 0 : i32
    %c0_i32_0 = arith.constant 0 : i32
    return %arg0, %c0_i32 : i32, i32
  }
}

</mosaic_0001>

<bundles_post_ra>
// kernel: tpu_custom_call.1
= control target key start
LH: loop header
LB: loop body
LE: loop exit
PB: predicated region body
PF: predicated region fallthrough
CT: control target
= control target key end

     0   :  { %s2344_s12 = smov 0   ;;  %s3009_s0 = inlined_call_operand.vmem [shape: bf16[2048,27], index: 0, kind: input, shape index: {}]   ;;  %s3010_s1 = inlined_call_operand.vmem [shape: bf16[27,32], index: 1, kind: input, shape index: {}]   ;;  %s3011_s2 = inlined_call_operand.vmem [shape: f32[1,32], index: 2, kind: input, shape index: {}]   ;;  %s3012_s3 = inlined_call_operand.vmem [shape: bf16[2048,32], index: 3, kind: output, shape index: {}]  }
   0x1 LB: > { %s1639_s13 = sadd.s32 4294967295, %s2321_s12   ;;  %p1643_p0 = scmp.ge.s32.totalorder %s2321_s12, 1  ;;  %s2321_s12 = sphi %s2344_s12, %s13_s12  }
   0x2   : > { %p138_p1 = scmp.lt.s32.totalorder %s2321_s12, 5 }
   0x4   : > { %p139_p2 = pnand %p1643_p0, %p138_p1 }
   0x6   : > { %142 = sbr.rel (%p139_p2) target bundleno = 385 (0x181), region = 32 }
   0xd   : > { %v2024_v0 = vld [vmem:[%s3010_s1] sm:$0xff]   ;;  %vm518_vm0 = vcmask 1044480   ;;  %v2025_v1 = vld [vmem:[%s3010_s1 + $0x8] sm:$0x3f]   ;;  %vm519_vm1 = vcmask 1045504   ;;  %s1644_s18 = sshll.u32 %s1639_s13, 6 }
   0xe   : > { %1943 = vmatprep.subr.bf16.mxu0 %v2024_v0  ;;  %2011 = vmatprep.subr.bf16.mxu1 %v2024_v0  ;;  %v2323_v2 = vmov 65535   ;;  %p163_p3 = scmp.lt.s32.totalorder %s1644_s18, 255  ;;  %vm421_vm2 = vcmask 220160   ;;  %v2435_v38 = vld [vmem:[%s3011_s2] ss:$0 sm:$0xff]  ;;  %vm1518_vm3 = vcmask 257024  }
   0xf   : > { %1944 = vmatpush3.bf16.msra.mxu0 %v2024_v0  ;;  %2013 = vmatpush3.bf16.msra.mxu1 %v2024_v0  ;;  %v520_v3 = vsel %vm518_vm0, 4294967295, %v2323_v2 }
  0x10   : > { %v521_v4 = vsel %vm519_vm1, %v520_v3, 0  ;;  %s3018_s18 = smov (!%p163_p3, %s1644_s18), 255 }
  0x11   : > { %v523_v5 = vand.u32 %v2025_v1, %v521_v4  ;;  %s1645_s19 = sshll.u32 %s3018_s18, 2 }
  0x12   : > { %s2366_s22 = scalar_lea.vmem %s3009_s0, %s1645_s19  ;;  %s2546_s27 = scalar_lea.vmem %s3012_s3, %s1645_s19 }
  0x13   : > { %1945 = vmatprep.subr.bf16.mxu0 %v523_v5  ;;  %2012 = vmatprep.subr.bf16.mxu1 %v523_v5  ;;  %v2026_v6 = vld [vmem:[%s2366_s22] sm:$0xff]   ;;  %v2028_v8 = vld [vmem:[%s2366_s22 + $0x8] sm:$0xff]   ;;  %v2030_v10 = vld [vmem:[%s2366_s22 + $0x10] sm:$0xff]  }
  0x14   : > { %1946 = vmatpush3.bf16.msra.mxu0 %v523_v5  ;;  %2014 = vmatpush3.bf16.msra.mxu1 %v523_v5  ;;  %v2027_v7 = vld [vmem:[%s2366_s22 + $0x80] sm:$0xff]   ;;  %v2029_v9 = vld [vmem:[%s2366_s22 + $0x88] sm:$0xff]   ;;  %v2031_v11 = vld [vmem:[%s2366_s22 + $0x90] sm:$0xff]  }
  0x15   : > { %1947 = vmatprep.mubr.msk.bf16.mxu0 %vm421_vm2, %v2026_v6  ;;  %1979 = vmatprep.mubr.msk.bf16.mxu1 %vm421_vm2, %v2027_v7  ;;  %v2032_v12 = vld [vmem:[%s2366_s22 + $0x18] sm:$0xff]   ;;  %v2034_v14 = vld [vmem:[%s2366_s22 + $0x20] sm:$0xff]   ;;  %v2036_v16 = vld [vmem:[%s2366_s22 + $0x28] sm:$0xff]  }
  0x16   : > { %v2033_v13 = vld [vmem:[%s2366_s22 + $0x98] sm:$0xff]   ;;  %v2035_v15 = vld [vmem:[%s2366_s22 + $0xa0] sm:$0xff]   ;;  %v2037_v17 = vld [vmem:[%s2366_s22 + $0xa8] sm:$0xff]  }
  0x17   : > { %1948 = vmatmul.mubr.msk.bf16.vlgmr.msra.gmra.mrb[0].mxu0 %vm421_vm2, %v2028_v8  ;;  %1980 = vmatmul.mubr.msk.bf16.vlgmr.msra.gmra.mrb[0].mxu1 %vm421_vm2, %v2029_v9  ;;  %v2038_v18 = vld [vmem:[%s2366_s22 + $0x30] sm:$0xff]   ;;  %v2040_v20 = vld [vmem:[%s2366_s22 + $0x38] sm:$0xff]   ;;  %v2042_v22 = vld [vmem:[%s2366_s22 + $0x40] sm:$0xff]  }
  0x18   : > { %1951 = vmatprep.mubr.msk.bf16.mxu0 %vm421_vm2, %v2030_v10  ;;  %1983 = vmatprep.mubr.msk.bf16.mxu1 %vm421_vm2, %v2031_v11  ;;  %v2039_v19 = vld [vmem:[%s2366_s22 + $0xb0] sm:$0xff]   ;;  %v2041_v21 = vld [vmem:[%s2366_s22 + $0xb8] sm:$0xff]   ;;  %v2043_v23 = vld [vmem:[%s2366_s22 + $0xc0] sm:$0xff]  }
  0x19   : > { %v2044_v24 = vld [vmem:[%s2366_s22 + $0x48] sm:$0xff]   ;;  %v2046_v26 = vld [vmem:[%s2366_s22 + $0x50] sm:$0xff]   ;;  %v2048_v28 = vld [vmem:[%s2366_s22 + $0x58] sm:$0xff]  }
  0x1a   : > { %v2045_v25 = vld [vmem:[%s2366_s22 + $0xc8] sm:$0xff]   ;;  %v2047_v27 = vld [vmem:[%s2366_s22 + $0xd0] sm:$0xff]   ;;  %v2049_v29 = vld [vmem:[%s2366_s22 + $0xd8] sm:$0xff]  }
  0x1b   : > { %v2050_v30 = vld [vmem:[%s2366_s22 + $0x60] sm:$0xff]   ;;  %v2052_v32 = vld [vmem:[%s2366_s22 + $0x68] sm:$0xff]   ;;  %v2054_v34 = vld [vmem:[%s2366_s22 + $0x70] sm:$0xff]  }
  0x1c   : > { %v2051_v31 = vld [vmem:[%s2366_s22 + $0xe0] sm:$0xff]   ;;  %v2053_v33 = vld [vmem:[%s2366_s22 + $0xe8] sm:$0xff]   ;;  %v2055_v35 = vld [vmem:[%s2366_s22 + $0xf0] sm:$0xff]  }
  0x1d   : > { %v2056_v36 = vld [vmem:[%s2366_s22 + $0x78] sm:$0xff]  }
  0x1e   : > { %v2057_v37 = vld [vmem:[%s2366_s22 + $0xf8] sm:$0xff]  }
  0x1f   : > { %1952 = vmatmul.mubr.msk.bf16.gmra.mrb[4].mxu0 %vm421_vm2, %v2032_v12  ;;  %1984 = vmatmul.mubr.msk.bf16.gmra.mrb[4].mxu1 %vm421_vm2, %v2033_v13 }
  0x20   : > { %1955 = vmatprep.mubr.msk.bf16.mxu0 %vm421_vm2, %v2034_v14  ;;  %1987 = vmatprep.mubr.msk.bf16.mxu1 %vm421_vm2, %v2035_v15 }
  0x27   : > { %1956 = vmatmul.mubr.msk.bf16.gmra.mrb[8].mxu0 %vm421_vm2, %v2036_v16  ;;  %1988 = vmatmul.mubr.msk.bf16.gmra.mrb[8].mxu1 %vm421_vm2, %v2037_v17 }
  0x28   : > { %1959 = vmatprep.mubr.msk.bf16.mxu0 %vm421_vm2, %v2038_v18  ;;  %1991 = vmatprep.mubr.msk.bf16.mxu1 %vm421_vm2, %v2039_v19 }
  0x2f   : > { %1960 = vmatmul.mubr.msk.bf16.gmra.mrb[12].mxu0 %vm421_vm2, %v2040_v20  ;;  %1992 = vmatmul.mubr.msk.bf16.gmra.mrb[12].mxu1 %vm421_vm2, %v2041_v21 }
  0x30   : > { %1963 = vmatprep.mubr.msk.bf16.mxu0 %vm421_vm2, %v2042_v22  ;;  %1995 = vmatprep.mubr.msk.bf16.mxu1 %vm421_vm2, %v2043_v23 }
  0x37   : > { %1964 = vmatmul.mubr.msk.bf16.gmra.mrb[16].mxu0 %vm421_vm2, %v2044_v24  ;;  %1996 = vmatmul.mubr.msk.bf16.gmra.mrb[16].mxu1 %vm421_vm2, %v2045_v25 }
  0x38   : > { %1967 = vmatprep.mubr.msk.bf16.mxu0 %vm421_vm2, %v2046_v26  ;;  %1999 = vmatprep.mubr.msk.bf16.mxu1 %vm421_vm2, %v2047_v27 }
  0x3f   : > { %1968 = vmatmul.mubr.msk.bf16.gmra.mrb[20].mxu0 %vm421_vm2, %v2048_v28  ;;  %2000 = vmatmul.mubr.msk.bf16.gmra.mrb[20].mxu1 %vm421_vm2, %v2049_v29 }
  0x40   : > { %1971 = vmatprep.mubr.msk.bf16.mxu0 %vm421_vm2, %v2050_v30  ;;  %2003 = vmatprep.mubr.msk.bf16.mxu1 %vm421_vm2, %v2051_v31 }
  0x47   : > { %1972 = vmatmul.mubr.msk.bf16.gmra.mrb[24].mxu0 %vm421_vm2, %v2052_v32  ;;  %2004 = vmatmul.mubr.msk.bf16.gmra.mrb[24].mxu1 %vm421_vm2, %v2053_v33 }
  0x48   : > { %1975 = vmatprep.mubr.msk.bf16.mxu0 %vm421_vm2, %v2054_v34  ;;  %2007 = vmatprep.mubr.msk.bf16.mxu1 %vm421_vm2, %v2055_v35 }
  0x4f   : > { %1976 = vmatmul.mubr.msk.bf16.gmra.mrb[28].mxu0 %vm421_vm2, %v2056_v36  ;;  %2008 = vmatmul.mubr.msk.bf16.gmra.mrb[28].mxu1 %vm421_vm2, %v2057_v37 }
  0xea   : > { %v1949_v39 = vpop.f32.mrb[0].mxu0  ;;  %v1981_v41 = vpop.f32.mrb[0].mxu1 }
  0xeb   : > { %v2438_v40 = vadd.f32 %v1949_v39, %v2435_v38  ;;  %v559_v42 = vpop.f32.mrb[1].mxu0  ;;  %v2441_v43 = vadd.f32 %v1981_v41, %v2435_v38  ;;  %v687_v45 = vpop.f32.mrb[1].mxu1 }
  0xec   : > { %v2444_v44 = vadd.f32 %v2435_v38, %v559_v42  ;;  %v1950_v46 = vpop.f32.mrb[2].mxu0  ;;  %v2448_v48 = vadd.f32 %v2435_v38, %v687_v45  ;;  %v1982_v50 = vpop.f32.mrb[2].mxu1 }
  0xed   : > { %v1717_v47 = vmul.f32 -1.442695, %v2438_v40  ;;  %v2451_v49 = vadd.f32 %v1950_v46, %v2435_v38  ;;  %v562_v51 = vpop.f32.mrb[3].mxu0  ;;  %v1749_v52 = vmul.f32 -1.442695, %v2441_v43  ;;  %v2456_v54 = vadd.f32 %v1982_v50, %v2435_v38  ;;  %v690_v56 = vpop.f32.mrb[3].mxu1 }
  0xee   : > { %v1715_v53 = vmul.f32 -1.442695, %v2444_v44  ;;  %v2459_v55 = vadd.f32 %v2435_v38, %v562_v51  ;;  %v1747_v57 = vmul.f32 -1.442695, %v2448_v48  ;;  %v2464_v59 = vadd.f32 %v2435_v38, %v690_v56 }
  0xef   : > { %2058 = vpow2.f32 %v1717_v47  ;;  %v1718_v58 = vmul.f32 -1.442695, %v2451_v49  ;;  %v1750_v60 = vmul.f32 -1.442695, %v2456_v54 }
  0xf0   : > { %2060 = vpow2.f32 %v1749_v52  ;;  %v1716_v61 = vmul.f32 -1.442695, %v2459_v55  ;;  %v1748_v62 = vmul.f32 -1.442695, %v2464_v59 }
  0xf1   : > { %2062 = vpow2.f32 %v1715_v53 }
  0xf2   : > { %2064 = vpow2.f32 %v1747_v57  ;;  %v1953_v63 = vpop.f32.mrb[4].mxu0  ;;  %v1985_v1 = vpop.f32.mrb[4].mxu1 }
  0xf3   : > { %2066 = vpow2.f32 %v1718_v58  ;;  %v2470_v0 = vadd.f32 %v1953_v63, %v2435_v38  ;;  %v575_v2 = vpop.f32.mrb[5].mxu0  ;;  %v2473_v3 = vadd.f32 %v1985_v1, %v2435_v38  ;;  %v703_v5 = vpop.f32.mrb[5].mxu1 }
  0xf4   : > { %2068 = vpow2.f32 %v1750_v60  ;;  %v2476_v4 = vadd.f32 %v2435_v38, %v575_v2  ;;  %v1954_v6 = vpop.f32.mrb[6].mxu0  ;;  %v2480_v8 = vadd.f32 %v2435_v38, %v703_v5  ;;  %v1986_v10 = vpop.f32.mrb[6].mxu1 }
  0xf5   : > { %2070 = vpow2.f32 %v1716_v61  ;;  %v1721_v7 = vmul.f32 -1.442695, %v2470_v0  ;;  %v2483_v9 = vadd.f32 %v1954_v6, %v2435_v38  ;;  %v578_v11 = vpop.f32.mrb[7].mxu0  ;;  %v1753_v12 = vmul.f32 -1.442695, %v2473_v3  ;;  %v706_v14 = vpop.f32.mrb[7].mxu1 }
  0xf6   : > { %2072 = vpow2.f32 %v1748_v62  ;;  %v1719_v13 = vmul.f32 -1.442695, %v2476_v4  ;;  %v1751_v15 = vmul.f32 -1.442695, %v2480_v8  ;;  %v2492_v39 = vadd.f32 %v1986_v10, %v2435_v38 }
  0xf7   : > { %2074 = vpow2.f32 %v1721_v7  ;;  %v1722_v16 = vmul.f32 -1.442695, %v2483_v9  ;;  %v2495_v45 = vadd.f32 %v2435_v38, %v578_v11  ;;  %v2498_v50 = vadd.f32 %v2435_v38, %v706_v14 }
  0xf8   : > { %2076 = vpow2.f32 %v1753_v12  ;;  %v1754_v61 = vmul.f32 -1.442695, %v2492_v39 }
  0xf9   : > { %v2059_v17 = vpop.eup %2058  ;;  %2078 = vpow2.f32 %v1719_v13  ;;  %v1720_v6 = vmul.f32 -1.442695, %v2495_v45  ;;  %v1752_v14 = vmul.f32 -1.442695, %v2498_v50 }
  0xfa   : > { %v2061_v18 = vpop.eup %2060  ;;  %v1008_v19 = vadd.f32 1.0, %v2059_v17  ;;  %2080 = vpow2.f32 %v1751_v15  ;;  %v1957_v20 = vpop.f32.mrb[8].mxu0 }
  0xfb   : > { %v2063_v21 = vpop.eup %2062  ;;  %v1040_v22 = vadd.f32 1.0, %v2061_v18  ;;  %2082 = vpow2.f32 %v1722_v16  ;;  %v1989_v23 = vpop.f32.mrb[8].mxu1  ;;  %v2501_v53 = vadd.f32 %v1957_v20, %v2435_v38 }
  0xfc   : > { %v591_v24 = vpop.f32.mrb[9].mxu0  ;;  %v2065_v25 = vpop.eup %2064  ;;  %2084 = vrcp.f32 %v1008_v19  ;;  %v1006_v26 = vadd.f32 1.0, %v2063_v21  ;;  %v2504_v56 = vadd.f32 %v1989_v23, %v2435_v38 }
  0xfd   : > { %v719_v27 = vpop.f32.mrb[9].mxu1  ;;  %v1958_v28 = vpop.f32.mrb[10].mxu0  ;;  %2086 = vrcp.f32 %v1040_v22  ;;  %v1038_v30 = vadd.f32 1.0, %v2065_v25  ;;  %v2510_v62 = vadd.f32 %v2435_v38, %v591_v24  ;;  %v1725_v20 = vmul.f32 -1.442695, %v2501_v53 }
  0xfe   : > { %v2067_v29 = vpop.eup %2066  ;;  %v1990_v31 = vpop.f32.mrb[10].mxu1  ;;  %2088 = vrcp.f32 %v1006_v26  ;;  %v2518_v7 = vadd.f32 %v2435_v38, %v719_v27  ;;  %v2526_v15 = vadd.f32 %v1958_v28, %v2435_v38  ;;  %v1757_v21 = vmul.f32 -1.442695, %v2504_v56 }
  0xff   : > { %v594_v32 = vpop.f32.mrb[11].mxu0  ;;  %v2069_v33 = vpop.eup %2068  ;;  %v1009_v34 = vadd.f32 1.0, %v2067_v29  ;;  %2090 = vrcp.f32 %v1038_v30  ;;  %v1723_v25 = vmul.f32 -1.442695, %v2510_v62  ;;  %v2539_v26 = vadd.f32 %v1990_v31, %v2435_v38 }
 0x100   : > { %v2489_v35 = vpop.f32.mrb[11].mxu1  ;;  %v2071_v36 = vpop.eup %2070  ;;  %v1041_v37 = vadd.f32 1.0, %v2069_v33  ;;  %v1755_v29 = vmul.f32 -1.442695, %v2518_v7 }
 0x101   : > { %v2073_v41 = vpop.eup %2072  ;;  %2092 = vrcp.f32 %v1009_v34  ;;  %v1007_v42 = vadd.f32 1.0, %v2071_v36  ;;  %v1726_v34 = vmul.f32 -1.442695, %v2526_v15 }
 0x102   : > { %v2075_v46 = vpop.eup %2074  ;;  %2094 = vrcp.f32 %v1041_v37  ;;  %v1039_v47 = vadd.f32 1.0, %v2073_v41  ;;  %v2506_v57 = vpop.f32.mrb[12].mxu0 }
 0x103   : > { %v2077_v51 = vpop.eup %2076  ;;  %2096 = vrcp.f32 %v1007_v42  ;;  %v1012_v52 = vadd.f32 1.0, %v2075_v46  ;;  %v2512_v63 = vpop.f32.mrb[12].mxu1 }
 0x104   : > { %v2079_v58 = vpop.eup %2078  ;;  %2098 = vrcp.f32 %v1039_v47  ;;  %v1044_v60 = vadd.f32 1.0, %v2077_v51  ;;  %v2514_v1 = vpop.f32.mrb[13].mxu0  ;;  %v1758_v47 = vmul.f32 -1.442695, %v2539_v26 }
 0x105   : > { %v2081_v2 = vpop.eup %2080  ;;  %2100 = vrcp.f32 %v1012_v52  ;;  %v1010_v5 = vadd.f32 1.0, %v2079_v58  ;;  %v2520_v10 = vpop.f32.mrb[13].mxu1 }
 0x106   : > { %v2522_v11 = vpop.f32.mrb[14].mxu0  ;;  %v2083_v12 = vpop.eup %2082  ;;  %2102 = vrcp.f32 %v1044_v60  ;;  %v1042_v13 = vadd.f32 1.0, %v2081_v2  ;;  %v2575_v60 = vadd.f32 %v2506_v57, %v2435_v38 }
 0x107   : > { %v2528_v16 = vpop.f32.mrb[14].mxu1  ;;  %v2530_v17 = vpop.f32.mrb[15].mxu0  ;;  %2104 = vrcp.f32 %v1010_v5  ;;  %v1013_v19 = vadd.f32 1.0, %v2083_v12 }
 0x108   : > { %v2085_v18 = vpop.eup %2084  ;;  %v2534_v22 = vpop.f32.mrb[15].mxu1  ;;  %2106 = vrcp.f32 %v1042_v13 }
 0x109   : > { %v2087_v23 = vpop.eup %2086  ;;  %v1200_v24 = vmul.f32 %v2085_v18, %v2438_v40  ;;  %2108 = vrcp.f32 %v1013_v19  ;;  %v2551_v40 = vadd.f32 %v2435_v38, %v594_v32 }
 0x10a   : > { %v2089_v27 = vpop.eup %2088  ;;  %v1232_v28 = vmul.f32 %v2087_v23, %v2441_v43  ;;  %2110 = vpow2.f32 %v1754_v61  ;;  %v2558_v43 = vadd.f32 %v2435_v38, %v2489_v35  ;;  %v2560_v42 = vpop.f32.mrb[16].mxu0 }
 0x10b   : > { %v2091_v30 = vpop.eup %2090  ;;  %v1847_v33 = vpack.c.bf16 %v1200_v24, %v1200_v24  ;;  %v1198_v31 = vmul.f32 %v2089_v27, %v2444_v44  ;;  %2112 = vpow2.f32 %v1720_v6  ;;  %v2566_v51 = vpop.f32.mrb[16].mxu1  ;;  %v1729_v27 = vmul.f32 -1.442695, %v2575_v60 }
 0x10c   : > { %v2093_v36 = vpop.eup %2092  ;;  %v1879_v37 = vpack.c.bf16 %v1232_v28, %v1232_v28  ;;  %v1230_v41 = vmul.f32 %v2091_v30, %v2448_v48  ;;  %2114 = vpow2.f32 %v1752_v14  ;;  %v2568_v48 = vpop.f32.mrb[17].mxu0  ;;  %v1756_v23 = vmul.f32 -1.442695, %v2558_v43 }
 0x10d   : > { %v2095_v32 = vpop.eup %2094  ;;  %1521 = vst.msk [vmem:[%s2546_s27 + $0x8] sm:$0xf] %vm1518_vm3, %v1847_v33  ;;  %v1845_v44 = vpack.c.bf16 %v1198_v31, %v1198_v31  ;;  %v1201_v46 = vmul.f32 %v2093_v36, %v2451_v49  ;;  %2116 = vpow2.f32 %v1725_v20  ;;  %v2577_v49 = vpop.f32.mrb[17].mxu1 }
 0x10e   : > { %v2097_v52 = vpop.eup %2096  ;;  %1553 = vst.msk [vmem:[%s2546_s27 + $0x88] sm:$0xf] %vm1518_vm3, %v1879_v37  ;;  %v1877_v35 = vpack.c.bf16 %v1230_v41, %v1230_v41  ;;  %v1233_v58 = vmul.f32 %v2095_v32, %v2456_v54  ;;  %v2579_v61 = vpop.f32.mrb[18].mxu0  ;;  %2118 = vpow2.f32 %v1757_v21  ;;  %v2586_v54 = vadd.f32 %v2512_v63, %v2435_v38 }
 0x10f   : > { %v2099_v2 = vpop.eup %2098  ;;  %1519 = vst.msk [vmem:[%s2546_s27] sm:$0xf] %vm1518_vm3, %v1845_v44  ;;  %v1848_v5 = vpack.c.bf16 %v1201_v46, %v1201_v46  ;;  %v1199_v6 = vmul.f32 %v2097_v52, %v2459_v55  ;;  %v2588_v12 = vpop.f32.mrb[18].mxu1  ;;  %2120 = vpow2.f32 %v1723_v25  ;;  %v1724_v55 = vmul.f32 -1.442695, %v2551_v40 }
 0x110   : > { %v2590_v57 = vpop.f32.mrb[19].mxu0  ;;  %v2101_v13 = vpop.eup %2100  ;;  %1551 = vst.msk [vmem:[%s2546_s27 + $0x80] sm:$0xf] %vm1518_vm3, %v1877_v35  ;;  %v1880_v14 = vpack.c.bf16 %v1233_v58, %v1233_v58  ;;  %v1231_v18 = vmul.f32 %v2099_v2, %v2464_v59  ;;  %2122 = vpow2.f32 %v1755_v29  ;;  %v1761_v29 = vmul.f32 -1.442695, %v2586_v54 }
 0x111   : > { %v2596_v19 = vpop.f32.mrb[19].mxu1  ;;  %v2103_v20 = vpop.eup %2102  ;;  %1522 = vst.msk [vmem:[%s2546_s27 + $0xc] sm:$0xf] %vm1518_vm3, %v1848_v5  ;;  %v1846_v63 = vpack.c.bf16 %v1199_v6, %v1199_v6  ;;  %v1204_v21 = vmul.f32 %v2101_v13, %v2470_v0  ;;  %2124 = vpow2.f32 %v1726_v34 }
 0x112   : > { %v2105_v24 = vpop.eup %2104  ;;  %1554 = vst.msk [vmem:[%s2546_s27 + $0x8c] sm:$0xf] %vm1518_vm3, %v1880_v14  ;;  %v1878_v59 = vpack.c.bf16 %v1231_v18, %v1231_v18  ;;  %v1236_v25 = vmul.f32 %v2103_v20, %v2473_v3  ;;  %2126 = vpow2.f32 %v1758_v47  ;;  %v2613_v34 = vpop.f32.mrb[20].mxu0  ;;  %v2642_v20 = vadd.f32 %v2435_v38, %v2514_v1 }
 0x113   : > { %v2107_v28 = vpop.eup %2106  ;;  %1520 = vst.msk [vmem:[%s2546_s27 + $0x4] sm:$0xf] %vm1518_vm3, %v1846_v63  ;;  %v1851_v30 = vpack.c.bf16 %v1204_v21, %v1204_v21  ;;  %v1202_v0 = vmul.f32 %v2105_v24, %v2476_v4  ;;  %2128 = vpow2.f32 %v1724_v55  ;;  %v2618_v41 = vpop.f32.mrb[20].mxu1  ;;  %v2649_v1 = vadd.f32 %v2435_v38, %v2520_v10 }
 0x114   : > { %v2109_v33 = vpop.eup %2108  ;;  %1552 = vst.msk [vmem:[%s2546_s27 + $0x84] sm:$0xf] %vm1518_vm3, %v1878_v59  ;;  %v1883_v31 = vpack.c.bf16 %v1236_v25, %v1236_v25  ;;  %v1234_v3 = vmul.f32 %v2107_v28, %v2480_v8  ;;  %2130 = vpow2.f32 %v1756_v23  ;;  %v2620_v32 = vpop.f32.mrb[21].mxu0 }
 0x115   : > { %v2111_v36 = vpop.eup %2110  ;;  %1525 = vst.msk [vmem:[%s2546_s27 + $0x18] sm:$0xf] %vm1518_vm3, %v1851_v30  ;;  %v1849_v37 = vpack.c.bf16 %v1202_v0, %v1202_v0  ;;  %v1205_v4 = vmul.f32 %v2109_v33, %v2483_v9  ;;  %2132 = vpow2.f32 %v1729_v27  ;;  %v2624_v47 = vpop.f32.mrb[21].mxu1  ;;  %v1727_v0 = vmul.f32 -1.442695, %v2642_v20 }
 0x116   : > { %v2113_v44 = vpop.eup %2112  ;;  %1557 = vst.msk [vmem:[%s2546_s27 + $0x98] sm:$0xf] %vm1518_vm3, %v1883_v31  ;;  %v1881_v8 = vpack.c.bf16 %v1234_v3, %v1234_v3  ;;  %v1045_v46 = vadd.f32 1.0, %v2111_v36  ;;  %v2626_v52 = vpop.f32.mrb[22].mxu0  ;;  %2134 = vpow2.f32 %v1761_v29  ;;  %v2657_v36 = vadd.f32 %v2522_v11, %v2435_v38 }
 0x117   : > { %v2115_v35 = vpop.eup %2114  ;;  %1523 = vst.msk [vmem:[%s2546_s27 + $0x10] sm:$0xf] %vm1518_vm3, %v1849_v37  ;;  %v1852_v9 = vpack.c.bf16 %v1205_v4, %v1205_v4  ;;  %v1011_v58 = vadd.f32 1.0, %v2113_v44  ;;  %v2630_v2 = vpop.f32.mrb[22].mxu1  ;;  %v2661_v37 = vadd.f32 %v2528_v16, %v2435_v38 }
 0x118   : > { %v2632_v5 = vpop.f32.mrb[23].mxu0  ;;  %v2117_v6 = vpop.eup %2116  ;;  %1555 = vst.msk [vmem:[%s2546_s27 + $0x90] sm:$0xf] %vm1518_vm3, %v1881_v8  ;;  %2136 = vrcp.f32 %v1045_v46  ;;  %v1043_v13 = vadd.f32 1.0, %v2115_v35  ;;  %v2669_v46 = vadd.f32 %v2435_v38, %v2530_v17  ;;  %v2673_v35 = vadd.f32 %v2435_v38, %v2534_v22 }
 0x119   : > { %v2636_v14 = vpop.f32.mrb[23].mxu1  ;;  %v2119_v18 = vpop.eup %2118  ;;  %1526 = vst.msk [vmem:[%s2546_s27 + $0x1c] sm:$0xf] %vm1518_vm3, %v1852_v9  ;;  %2138 = vrcp.f32 %v1011_v58  ;;  %v1016_v55 = vadd.f32 1.0, %v2117_v6  ;;  %v2681_v6 = vadd.f32 %v2560_v42, %v2435_v38  ;;  %v1730_v42 = vmul.f32 -1.442695, %v2657_v36 }
 0x11a   : > { %v2121_v63 = vpop.eup %2120  ;;  %2140 = vrcp.f32 %v1043_v13  ;;  %v1048_v21 = vadd.f32 1.0, %v2119_v18  ;;  %v2644_v27 = vpop.f32.mrb[24].mxu0  ;;  %v2685_v13 = vadd.f32 %v2566_v51, %v2435_v38 }
 0x11b   : > { %v2123_v23 = vpop.eup %2122  ;;  %2142 = vrcp.f32 %v1016_v55  ;;  %v1014_v24 = vadd.f32 1.0, %v2121_v63  ;;  %v2651_v29 = vpop.f32.mrb[24].mxu1  ;;  %v1759_v55 = vmul.f32 -1.442695, %v2649_v1  ;;  %v2692_v63 = vadd.f32 %v2435_v38, %v2568_v48 }
 0x11c   : > { %v2125_v59 = vpop.eup %2124  ;;  %2144 = vrcp.f32 %v1048_v21  ;;  %v1046_v25 = vadd.f32 1.0, %v2123_v23  ;;  %v2653_v33 = vpop.f32.mrb[25].mxu0  ;;  %v1733_v48 = vmul.f32 -1.442695, %v2681_v6 }
 0x11d   : > { %v2127_v28 = vpop.eup %2126  ;;  %2146 = vrcp.f32 %v1014_v24  ;;  %v1017_v30 = vadd.f32 1.0, %v2125_v59  ;;  %v2663_v4 = vpop.f32.mrb[25].mxu1  ;;  %v1762_v24 = vmul.f32 -1.442695, %v2661_v37 }
 0x11e   : > { %v2129_v31 = vpop.eup %2128  ;;  %2148 = vrcp.f32 %v1046_v25  ;;  %v1049_v3 = vadd.f32 1.0, %v2127_v28  ;;  %v2665_v44 = vpop.f32.mrb[26].mxu0  ;;  %v1728_v25 = vmul.f32 -1.442695, %v2669_v46  ;;  %v1760_v28 = vmul.f32 -1.442695, %v2673_v35 }
 0x11f   : > { %v2131_v10 = vpop.eup %2130  ;;  %2150 = vrcp.f32 %v1017_v30  ;;  %v1015_v8 = vadd.f32 1.0, %v2129_v31  ;;  %v2675_v11 = vpop.f32.mrb[26].mxu1 }
 0x120   : > { %v2677_v9 = vpop.f32.mrb[27].mxu0  ;;  %v2133_v16 = vpop.eup %2132  ;;  %2152 = vrcp.f32 %v1049_v3  ;;  %v1047_v58 = vadd.f32 1.0, %v2131_v10  ;;  %v1765_v3 = vmul.f32 -1.442695, %v2685_v13 }
 0x121   : > { %v2687_v17 = vpop.f32.mrb[27].mxu1  ;;  %v2135_v18 = vpop.eup %2134  ;;  %2154 = vrcp.f32 %v1015_v8  ;;  %v1020_v22 = vadd.f32 1.0, %v2133_v16 }
 0x122   : > { %v2137_v21 = vpop.eup %2136  ;;  %2156 = vrcp.f32 %v1047_v58  ;;  %v1052_v23 = vadd.f32 1.0, %v2135_v18  ;;  %v2702_v10 = vpop.f32.mrb[28].mxu0  ;;  %v1731_v58 = vmul.f32 -1.442695, %v2692_v63 }
 0x123   : > { %v2139_v51 = vpop.eup %2138  ;;  %v1237_v59 = vmul.f32 %v2137_v21, %v2492_v39  ;;  %2158 = vrcp.f32 %v1020_v22  ;;  %v2706_v18 = vpop.f32.mrb[28].mxu1 }
 0x124   : > { %v2141_v30 = vpop.eup %2140  ;;  %v1203_v31 = vmul.f32 %v2139_v51, %v2495_v45  ;;  %2160 = vrcp.f32 %v1052_v23  ;;  %v2708_v22 = vpop.f32.mrb[29].mxu0  ;;  %v2713_v51 = vadd.f32 %v2435_v38, %v2577_v49 }
 0x125   : > { %v2143_v8 = vpop.eup %2142  ;;  %v1884_v16 = vpack.c.bf16 %v1237_v59, %v1237_v59  ;;  %v1235_v39 = vmul.f32 %v2141_v30, %v2498_v50  ;;  %2162 = vpow2.f32 %v1727_v0  ;;  %3013 = vst [vmem:[#allocation2_spill] sm:$0xff] %v2708_v22  ;;  %v2715_v59 = vpop.f32.mrb[29].mxu1 }
 0x126   : > { %v2145_v45 = vpop.eup %2144  ;;  %v1850_v21 = vpack.c.bf16 %v1203_v31, %v1203_v31  ;;  %v1208_v23 = vmul.f32 %v2143_v8, %v2501_v53  ;;  %2164 = vpow2.f32 %v1759_v55  ;;  %v2717_v50 = vpop.f32.mrb[30].mxu0  ;;  %v2724_v53 = vadd.f32 %v2579_v61, %v2435_v38 }
 0x127   : > { %3014 = vst [vmem:[#allocation3_spill] sm:$0xff] %v2717_v50  ;;  %v2147_v0 = vpop.eup %2146  ;;  %1558 = vst.msk [vmem:[%s2546_s27 + $0x9c] sm:$0xf] %vm1518_vm3, %v1884_v16  ;;  %v1882_v30 = vpack.c.bf16 %v1235_v39, %v1235_v39  ;;  %v1240_v22 = vmul.f32 %v2145_v45, %v2504_v56  ;;  %2166 = vpow2.f32 %v1730_v42  ;;  %v2726_v55 = vpop.f32.mrb[30].mxu1  ;;  %v2735_v56 = vadd.f32 %v2588_v12, %v2435_v38 }
 0x128   : > { %v2728_v49 = vpop.f32.mrb[31].mxu0  ;;  %v2149_v31 = vpop.eup %2148  ;;  %1524 = vst.msk [vmem:[%s2546_s27 + $0x14] sm:$0xf] %vm1518_vm3, %v1850_v21  ;;  %v1855_v8 = vpack.c.bf16 %v1208_v23, %v1208_v23  ;;  %v1206_v50 = vmul.f32 %v2147_v0, %v2510_v62  ;;  %2168 = vpow2.f32 %v1762_v24  ;;  %v2744_v45 = vadd.f32 %v2435_v38, %v2590_v57 }
 0x129   : > { %v2737_v42 = vpop.f32.mrb[31].mxu1  ;;  %v2151_v61 = vpop.eup %2150  ;;  %1556 = vst.msk [vmem:[%s2546_s27 + $0x94] sm:$0xf] %vm1518_vm3, %v1882_v30  ;;  %v1887_v16 = vpack.c.bf16 %v1240_v22, %v1240_v22  ;;  %v1238_v39 = vmul.f32 %v2149_v31, %v2518_v7  ;;  %2170 = vpow2.f32 %v1728_v25  ;;  %v1763_v21 = vmul.f32 -1.442695, %v2713_v51 }
 0x12a   : > { %v2153_v62 = vpop.eup %2152  ;;  %1529 = vst.msk [vmem:[%s2546_s27 + $0x28] sm:$0xf] %vm1518_vm3, %v1855_v8  ;;  %v1853_v24 = vpack.c.bf16 %v1206_v50, %v1206_v50  ;;  %v1209_v12 = vmul.f32 %v2151_v61, %v2526_v15  ;;  %2172 = vpow2.f32 %v1760_v28  ;;  %v1734_v57 = vmul.f32 -1.442695, %v2724_v53 }
 0x12b   : > { %v2155_v23 = vpop.eup %2154  ;;  %1561 = vst.msk [vmem:[%s2546_s27 + $0xa8] sm:$0xf] %vm1518_vm3, %v1887_v16  ;;  %v1885_v7 = vpack.c.bf16 %v1238_v39, %v1238_v39  ;;  %v1241_v25 = vmul.f32 %v2153_v62, %v2539_v26  ;;  %2174 = vpow2.f32 %v1733_v48  ;;  %v1766_v28 = vmul.f32 -1.442695, %v2735_v56 }
 0x12c   : > { %v2157_v22 = vpop.eup %2156  ;;  %1527 = vst.msk [vmem:[%s2546_s27 + $0x20] sm:$0xf] %vm1518_vm3, %v1853_v24  ;;  %v1856_v50 = vpack.c.bf16 %v1209_v12, %v1209_v12  ;;  %v1207_v15 = vmul.f32 %v2155_v23, %v2551_v40  ;;  %2176 = vpow2.f32 %v1765_v3  ;;  %v1732_v48 = vmul.f32 -1.442695, %v2744_v45 }
 0x12d   : > { %v2159_v0 = vpop.eup %2158  ;;  %1559 = vst.msk [vmem:[%s2546_s27 + $0xa0] sm:$0xf] %vm1518_vm3, %v1885_v7  ;;  %v1888_v30 = vpack.c.bf16 %v1241_v25, %v1241_v25  ;;  %v1239_v26 = vmul.f32 %v2157_v22, %v2558_v43  ;;  %2178 = vpow2.f32 %v1731_v58 }
 0x12e   : > { %v2161_v31 = vpop.eup %2160  ;;  %1530 = vst.msk [vmem:[%s2546_s27 + $0x2c] sm:$0xf] %vm1518_vm3, %v1856_v50  ;;  %v1854_v8 = vpack.c.bf16 %v1207_v15, %v1207_v15  ;;  %v1212_v40 = vmul.f32 %v2159_v0, %v2575_v60  ;;  %2180 = vpow2.f32 %v1763_v21 }
 0x12f   : > { %v2163_v3 = vpop.eup %2162  ;;  %1562 = vst.msk [vmem:[%s2546_s27 + $0xac] sm:$0xf] %vm1518_vm3, %v1888_v30  ;;  %v1886_v61 = vpack.c.bf16 %v1239_v26, %v1239_v26  ;;  %v1244_v16 = vmul.f32 %v2161_v31, %v2586_v54  ;;  %2182 = vpow2.f32 %v1734_v57  ;;  %v2778_v57 = vadd.f32 %v2435_v38, %v2596_v19 }
 0x130   : > { %v2165_v43 = vpop.eup %2164  ;;  %1528 = vst.msk [vmem:[%s2546_s27 + $0x24] sm:$0xf] %vm1518_vm3, %v1854_v8  ;;  %v1859_v58 = vpack.c.bf16 %v1212_v40, %v1212_v40  ;;  %v1018_v39 = vadd.f32 1.0, %v2163_v3  ;;  %2184 = vpow2.f32 %v1766_v28  ;;  %v2782_v26 = vadd.f32 %v2613_v34, %v2435_v38 }
 0x131   : > { %v2167_v62 = vpop.eup %2166  ;;  %1560 = vst.msk [vmem:[%s2546_s27 + $0xa4] sm:$0xf] %vm1518_vm3, %v1886_v61  ;;  %v1891_v60 = vpack.c.bf16 %v1244_v16, %v1244_v16  ;;  %v1050_v24 = vadd.f32 1.0, %v2165_v43  ;;  %2186 = vpow2.f32 %v1732_v48  ;;  %v2786_v48 = vadd.f32 %v2618_v41, %v2435_v38 }
 0x132   : > { %v2169_v12 = vpop.eup %2168  ;;  %1533 = vst.msk [vmem:[%s2546_s27 + $0x38] sm:$0xf] %vm1518_vm3, %v1859_v58  ;;  %2188 = vrcp.f32 %v1018_v39  ;;  %v1021_v21 = vadd.f32 1.0, %v2167_v62  ;;  %v1764_v8 = vmul.f32 -1.442695, %v2778_v57  ;;  %v2791_v40 = vadd.f32 %v2435_v38, %v2620_v32 }
 0x133   : > { %v2171_v54 = vpop.eup %2170  ;;  %1565 = vst.msk [vmem:[%s2546_s27 + $0xb8] sm:$0xf] %vm1518_vm3, %v1891_v60  ;;  %2190 = vrcp.f32 %v1050_v24  ;;  %v1053_v23 = vadd.f32 1.0, %v2169_v12  ;;  %v2795_v34 = vadd.f32 %v2435_v38, %v2624_v47  ;;  %v2799_v41 = vadd.f32 %v2626_v52, %v2435_v38 }
 0x134   : > { %v2173_v7 = vpop.eup %2172  ;;  %2192 = vrcp.f32 %v1021_v21  ;;  %v1019_v25 = vadd.f32 1.0, %v2171_v54  ;;  %v2803_v58 = vadd.f32 %v2630_v2, %v2435_v38  ;;  %v2807_v32 = vadd.f32 %v2435_v38, %v2632_v5 }
 0x135   : > { %v2175_v22 = vpop.eup %2174  ;;  %2194 = vrcp.f32 %v1053_v23  ;;  %v1051_v50 = vadd.f32 1.0, %v2173_v7  ;;  %v1737_v47 = vmul.f32 -1.442695, %v2782_v26  ;;  %v1769_v60 = vmul.f32 -1.442695, %v2786_v48 }
 0x136   : > { %v2177_v15 = vpop.eup %2176  ;;  %2196 = vrcp.f32 %v1019_v25  ;;  %v1024_v28 = vadd.f32 1.0, %v2175_v22  ;;  %v1735_v12 = vmul.f32 -1.442695, %v2791_v40  ;;  %v2814_v2 = vadd.f32 %v2435_v38, %v2636_v14 }
 0x137   : > { %v2179_v0 = vpop.eup %2178  ;;  %2198 = vrcp.f32 %v1051_v50  ;;  %v1056_v30 = vadd.f32 1.0, %v2177_v15  ;;  %v1767_v54 = vmul.f32 -1.442695, %v2795_v34  ;;  %v1738_v23 = vmul.f32 -1.442695, %v2799_v41 }
 0x138   : > { %v2181_v31 = vpop.eup %2180  ;;  %2200 = vrcp.f32 %v1024_v28  ;;  %v1022_v19 = vadd.f32 1.0, %v2179_v0  ;;  %v1770_v22 = vmul.f32 -1.442695, %v2803_v58  ;;  %v1736_v50 = vmul.f32 -1.442695, %v2807_v32 }
 0x139   : > { %v2183_v3 = vpop.eup %2182  ;;  %2202 = vrcp.f32 %v1056_v30  ;;  %v1054_v61 = vadd.f32 1.0, %v2181_v31 }
 0x13a   : > { %v2185_v16 = vpop.eup %2184  ;;  %2204 = vrcp.f32 %v1022_v19  ;;  %v1025_v43 = vadd.f32 1.0, %v2183_v3 }
 0x13b   : > { %v2187_v39 = vpop.eup %2186  ;;  %2206 = vrcp.f32 %v1054_v61  ;;  %v1057_v62 = vadd.f32 1.0, %v2185_v16  ;;  %v2841_v16 = vadd.f32 %v2435_v38, %v2653_v33 }
 0x13c   : > { %v2189_v52 = vpop.eup %2188  ;;  %2208 = vrcp.f32 %v1025_v43  ;;  %v1023_v24 = vadd.f32 1.0, %v2187_v39 }
 0x13d   : > { %v2191_v21 = vpop.eup %2190  ;;  %v1210_v5 = vmul.f32 %v2189_v52, %v2642_v20  ;;  %2210 = vrcp.f32 %v1057_v62  ;;  %v2825_v20 = vadd.f32 %v2644_v27, %v2435_v38  ;;  %v2834_v27 = vadd.f32 %v2651_v29, %v2435_v38 }
 0x13e   : > { %v2193_v7 = vpop.eup %2192  ;;  %v1242_v25 = vmul.f32 %v2191_v21, %v2649_v1  ;;  %2212 = vrcp.f32 %v1023_v24  ;;  %v1768_v1 = vmul.f32 -1.442695, %v2814_v2  ;;  %v2848_v29 = vadd.f32 %v2435_v38, %v2663_v4 }
 0x13f   : > { %v2195_v15 = vpop.eup %2194  ;;  %v1857_v14 = vpack.c.bf16 %v1210_v5, %v1210_v5  ;;  %v1213_v28 = vmul.f32 %v2193_v7, %v2657_v36  ;;  %2214 = vpow2.f32 %v1764_v8  ;;  %v1741_v33 = vmul.f32 -1.442695, %v2825_v20 }
 0x140   : > { %v2197_v0 = vpop.eup %2196  ;;  %v1889_v30 = vpack.c.bf16 %v1242_v25, %v1242_v25  ;;  %v1245_v31 = vmul.f32 %v2195_v15, %v2661_v37  ;;  %2216 = vpow2.f32 %v1737_v47  ;;  %v1773_v38 = vmul.f32 -1.442695, %v2834_v27 }
 0x141   : > { %v2199_v19 = vpop.eup %2198  ;;  %1531 = vst.msk [vmem:[%s2546_s27 + $0x30] sm:$0xf] %vm1518_vm3, %v1857_v14  ;;  %v1860_v3 = vpack.c.bf16 %v1213_v28, %v1213_v28  ;;  %v1211_v61 = vmul.f32 %v2197_v0, %v2669_v46  ;;  %2218 = vpow2.f32 %v1769_v60 }
 0x142   : > { %v2201_v36 = vpop.eup %2200  ;;  %1563 = vst.msk [vmem:[%s2546_s27 + $0xb0] sm:$0xf] %vm1518_vm3, %v1889_v30  ;;  %v1892_v37 = vpack.c.bf16 %v1245_v31, %v1245_v31  ;;  %v1243_v8 = vmul.f32 %v2199_v19, %v2673_v35  ;;  %2220 = vpow2.f32 %v1735_v12  ;;  %v1739_v12 = vmul.f32 -1.442695, %v2841_v16 }
 0x143   : > { %v2203_v43 = vpop.eup %2202  ;;  %1534 = vst.msk [vmem:[%s2546_s27 + $0x3c] sm:$0xf] %vm1518_vm3, %v1860_v3  ;;  %v1858_v46 = vpack.c.bf16 %v1211_v61, %v1211_v61  ;;  %v1216_v39 = vmul.f32 %v2201_v36, %v2681_v6  ;;  %2222 = vpow2.f32 %v1767_v54  ;;  %v1771_v54 = vmul.f32 -1.442695, %v2848_v29 }
 0x144   : > { %v2205_v62 = vpop.eup %2204  ;;  %1566 = vst.msk [vmem:[%s2546_s27 + $0xbc] sm:$0xf] %vm1518_vm3, %v1892_v37  ;;  %v1890_v35 = vpack.c.bf16 %v1243_v8, %v1243_v8  ;;  %v1248_v47 = vmul.f32 %v2203_v43, %v2685_v13  ;;  %2224 = vpow2.f32 %v1738_v23 }
 0x145   : > { %v2207_v60 = vpop.eup %2206  ;;  %1532 = vst.msk [vmem:[%s2546_s27 + $0x34] sm:$0xf] %vm1518_vm3, %v1858_v46  ;;  %v1863_v6 = vpack.c.bf16 %v1216_v39, %v1216_v39  ;;  %v1214_v52 = vmul.f32 %v2205_v62, %v2692_v63  ;;  %2226 = vpow2.f32 %v1770_v22  ;;  %v2314_v39 = vld [vmem:[%s3011_s2] ss:$0 sm:$0xff] }
 0x146   : > { %v2209_v4 = vpop.eup %2208  ;;  %1564 = vst.msk [vmem:[%s2546_s27 + $0xb4] sm:$0xf] %vm1518_vm3, %v1890_v35  ;;  %v1895_v24 = vpack.c.bf16 %v1248_v47, %v1248_v47  ;;  %v1246_v13 = vmul.f32 %v2207_v60, %v2713_v51  ;;  %2228 = vpow2.f32 %v1736_v50  ;;  %v2884_v62 = vadd.f32 %v2314_v39, %v2665_v44 }
 0x147   : > { %v2211_v21 = vpop.eup %2210  ;;  %1537 = vst.msk [vmem:[%s2546_s27 + $0x48] sm:$0xf] %vm1518_vm3, %v1863_v6  ;;  %v1861_v5 = vpack.c.bf16 %v1214_v52, %v1214_v52  ;;  %v1217_v63 = vmul.f32 %v2209_v4, %v2724_v53  ;;  %2230 = vpow2.f32 %v1768_v1  ;;  %v2887_v35 = vadd.f32 %v2314_v39, %v2675_v11 }
 0x148   : > { %v2213_v23 = vpop.eup %2212  ;;  %1569 = vst.msk [vmem:[%s2546_s27 + $0xc8] sm:$0xf] %vm1518_vm3, %v1895_v24  ;;  %v1893_v7 = vpack.c.bf16 %v1246_v13, %v1246_v13  ;;  %v1249_v51 = vmul.f32 %v2211_v21, %v2735_v56  ;;  %2232 = vpow2.f32 %v1741_v33  ;;  %v2890_v60 = vadd.f32 %v2314_v39, %v2677_v9  ;;  %v3015_v13 = vld [vmem:[#allocation2_spill] sm:$0xff] }
 0x149   : > { %v2215_v25 = vpop.eup %2214  ;;  %1535 = vst.msk [vmem:[%s2546_s27 + $0x40] sm:$0xf] %vm1518_vm3, %v1861_v5  ;;  %v1864_v22 = vpack.c.bf16 %v1217_v63, %v1217_v63  ;;  %v1215_v50 = vmul.f32 %v2213_v23, %v2744_v45  ;;  %2234 = vpow2.f32 %v1773_v38  ;;  %v2893_v6 = vadd.f32 %v2314_v39, %v2687_v17 }
 0x14a   : > { %v2217_v53 = vpop.eup %2216  ;;  %1567 = vst.msk [vmem:[%s2546_s27 + $0xc0] sm:$0xf] %vm1518_vm3, %v1893_v7  ;;  %v1896_v15 = vpack.c.bf16 %v1249_v51, %v1249_v51  ;;  %v1055_v14 = vadd.f32 1.0, %v2215_v25  ;;  %2236 = vpow2.f32 %v1739_v12  ;;  %v2896_v4 = vadd.f32 %v2314_v39, %v2702_v10 }
 0x14b   : > { %v2219_v28 = vpop.eup %2218  ;;  %1538 = vst.msk [vmem:[%s2546_s27 + $0x4c] sm:$0xf] %vm1518_vm3, %v1864_v22  ;;  %v1862_v56 = vpack.c.bf16 %v1215_v50, %v1215_v50  ;;  %v1028_v0 = vadd.f32 1.0, %v2217_v53  ;;  %2238 = vpow2.f32 %v1771_v54  ;;  %v2899_v44 = vadd.f32 %v2314_v39, %v2706_v18 }
 0x14c   : > { %v2221_v30 = vpop.eup %2220  ;;  %1570 = vst.msk [vmem:[%s2546_s27 + $0xcc] sm:$0xf] %vm1518_vm3, %v1896_v15  ;;  %2240 = vrcp.f32 %v1055_v14  ;;  %v1060_v31 = vadd.f32 1.0, %v2219_v28  ;;  %v2902_v12 = vadd.f32 %v2314_v39, %v3015_v13  ;;  %v2905_v9 = vadd.f32 %v2314_v39, %v2715_v59 }
 0x14d   : > { %v2223_v45 = vpop.eup %2222  ;;  %1536 = vst.msk [vmem:[%s2546_s27 + $0x44] sm:$0xf] %vm1518_vm3, %v1862_v56  ;;  %2242 = vrcp.f32 %v1028_v0  ;;  %v1026_v1 = vadd.f32 1.0, %v2221_v30  ;;  %v1742_v5 = vmul.f32 -1.442695, %v2884_v62 }
 0x14e   : > { %v2225_v19 = vpop.eup %2224  ;;  %2244 = vrcp.f32 %v1060_v31  ;;  %v1058_v3 = vadd.f32 1.0, %v2223_v45  ;;  %v1774_v10 = vmul.f32 -1.442695, %v2887_v35  ;;  %v1740_v54 = vmul.f32 -1.442695, %v2890_v60 }
 0x14f   : > { %v2227_v61 = vpop.eup %2226  ;;  %2246 = vrcp.f32 %v1026_v1  ;;  %v1029_v36 = vadd.f32 1.0, %v2225_v19  ;;  %v1772_v23 = vmul.f32 -1.442695, %v2893_v6  ;;  %v1745_v59 = vmul.f32 -1.442695, %v2896_v4 }
 0x150   : > { %v2229_v37 = vpop.eup %2228  ;;  %2248 = vrcp.f32 %v1058_v3  ;;  %v1061_v8 = vadd.f32 1.0, %v2227_v61  ;;  %v1777_v25 = vmul.f32 -1.442695, %v2899_v44  ;;  %v1743_v53 = vmul.f32 -1.442695, %v2902_v12 }
 0x151   : > { %v2231_v43 = vpop.eup %2230  ;;  %2250 = vrcp.f32 %v1029_v36  ;;  %v1027_v46 = vadd.f32 1.0, %v2229_v37  ;;  %v1775_v15 = vmul.f32 -1.442695, %v2905_v9 }
 0x152   : > { %v2233_v47 = vpop.eup %2232  ;;  %2252 = vrcp.f32 %v1061_v8  ;;  %v1059_v33 = vadd.f32 1.0, %v2231_v43 }
 0x153   : > { %v2235_v52 = vpop.eup %2234  ;;  %2254 = vrcp.f32 %v1027_v46  ;;  %v1032_v38 = vadd.f32 1.0, %v2233_v47 }
 0x154   : > { %v2237_v11 = vpop.eup %2236  ;;  %2256 = vrcp.f32 %v1059_v33  ;;  %v1064_v24 = vadd.f32 1.0, %v2235_v52 }
 0x155   : > { %v2239_v17 = vpop.eup %2238  ;;  %2258 = vrcp.f32 %v1032_v38  ;;  %v1030_v21 = vadd.f32 1.0, %v2237_v11 }
 0x156   : > { %v2241_v63 = vpop.eup %2240  ;;  %2260 = vrcp.f32 %v1064_v24  ;;  %v1062_v18 = vadd.f32 1.0, %v2239_v17 }
 0x157   : > { %v2243_v7 = vpop.eup %2242  ;;  %v1247_v51 = vmul.f32 %v2241_v63, %v2778_v57  ;;  %2262 = vrcp.f32 %v1030_v21  ;;  %v3016_v57 = vld [vmem:[#allocation3_spill] sm:$0xff] }
 0x158   : > { %v2245_v22 = vpop.eup %2244  ;;  %v1220_v50 = vmul.f32 %v2243_v7, %v2782_v26  ;;  %2264 = vrcp.f32 %v1062_v18  ;;  %v2919_v0 = vadd.f32 %v2314_v39, %v3016_v57  ;;  %v2923_v26 = vadd.f32 %v2314_v39, %v2726_v55 }
 0x159   : > { %v2247_v14 = vpop.eup %2246  ;;  %v1894_v28 = vpack.c.bf16 %v1247_v51, %v1247_v51  ;;  %v1252_v56 = vmul.f32 %v2245_v22, %v2786_v48  ;;  %2266 = vpow2.f32 %v1742_v5  ;;  %v2929_v48 = vadd.f32 %v2314_v39, %v2728_v49 }
 0x15a   : > { %v2249_v30 = vpop.eup %2248  ;;  %v1867_v31 = vpack.c.bf16 %v1220_v50, %v1220_v50  ;;  %v1218_v45 = vmul.f32 %v2247_v14, %v2791_v40  ;;  %2268 = vpow2.f32 %v1774_v10  ;;  %v2935_v55 = vadd.f32 %v2314_v39, %v2737_v42 }
 0x15b   : > { %v2251_v1 = vpop.eup %2250  ;;  %1568 = vst.msk [vmem:[%s2546_s27 + $0xc4] sm:$0xf] %vm1518_vm3, %v1894_v28  ;;  %v1899_v19 = vpack.c.bf16 %v1252_v56, %v1252_v56  ;;  %v1250_v3 = vmul.f32 %v2249_v30, %v2795_v34  ;;  %2270 = vpow2.f32 %v1740_v54  ;;  %v1746_v49 = vmul.f32 -1.442695, %v2919_v0 }
 0x15c   : > { %v2253_v61 = vpop.eup %2252  ;;  %1541 = vst.msk [vmem:[%s2546_s27 + $0x58] sm:$0xf] %vm1518_vm3, %v1867_v31  ;;  %v1865_v40 = vpack.c.bf16 %v1218_v45, %v1218_v45  ;;  %v1221_v36 = vmul.f32 %v2251_v1, %v2799_v41  ;;  %2272 = vpow2.f32 %v1772_v23  ;;  %v1778_v42 = vmul.f32 -1.442695, %v2923_v26 }
 0x15d   : > { %v2255_v37 = vpop.eup %2254  ;;  %1573 = vst.msk [vmem:[%s2546_s27 + $0xd8] sm:$0xf] %vm1518_vm3, %v1899_v19  ;;  %v1897_v34 = vpack.c.bf16 %v1250_v3, %v1250_v3  ;;  %v1253_v8 = vmul.f32 %v2253_v61, %v2803_v58  ;;  %2274 = vpow2.f32 %v1745_v59  ;;  %v1744_v33 = vmul.f32 -1.442695, %v2929_v48 }
 0x15e   : > { %v2257_v43 = vpop.eup %2256  ;;  %1539 = vst.msk [vmem:[%s2546_s27 + $0x50] sm:$0xf] %vm1518_vm3, %v1865_v40  ;;  %v1868_v46 = vpack.c.bf16 %v1221_v36, %v1221_v36  ;;  %v1219_v41 = vmul.f32 %v2255_v37, %v2807_v32  ;;  %2276 = vpow2.f32 %v1777_v25  ;;  %v1776_v11 = vmul.f32 -1.442695, %v2935_v55 }
 0x15f   : > { %v2259_v39 = vpop.eup %2258  ;;  %1571 = vst.msk [vmem:[%s2546_s27 + $0xd0] sm:$0xf] %vm1518_vm3, %v1897_v34  ;;  %v1900_v47 = vpack.c.bf16 %v1253_v8, %v1253_v8  ;;  %v1251_v58 = vmul.f32 %v2257_v43, %v2814_v2  ;;  %2278 = vpow2.f32 %v1743_v53 }
 0x160   : > { %v2261_v52 = vpop.eup %2260  ;;  %1542 = vst.msk [vmem:[%s2546_s27 + $0x5c] sm:$0xf] %vm1518_vm3, %v1868_v46  ;;  %v1866_v38 = vpack.c.bf16 %v1219_v41, %v1219_v41  ;;  %v1224_v32 = vmul.f32 %v2259_v39, %v2825_v20  ;;  %2280 = vpow2.f32 %v1775_v15 }
 0x161   : > { %v2263_v24 = vpop.eup %2262  ;;  %1574 = vst.msk [vmem:[%s2546_s27 + $0xdc] sm:$0xf] %vm1518_vm3, %v1900_v47  ;;  %v1898_v13 = vpack.c.bf16 %v1251_v58, %v1251_v58  ;;  %v1256_v2 = vmul.f32 %v2261_v52, %v2834_v27  ;;  %2282 = vpow2.f32 %v1746_v49 }
 0x162   : > { %v2265_v17 = vpop.eup %2264  ;;  %1540 = vst.msk [vmem:[%s2546_s27 + $0x54] sm:$0xf] %vm1518_vm3, %v1866_v38  ;;  %v1871_v21 = vpack.c.bf16 %v1224_v32, %v1224_v32  ;;  %v1222_v5 = vmul.f32 %v2263_v24, %v2841_v16  ;;  %2284 = vpow2.f32 %v1778_v42 }
 0x163   : > { %v2267_v20 = vpop.eup %2266  ;;  %1572 = vst.msk [vmem:[%s2546_s27 + $0xd4] sm:$0xf] %vm1518_vm3, %v1898_v13  ;;  %v1903_v10 = vpack.c.bf16 %v1256_v2, %v1256_v2  ;;  %v1254_v63 = vmul.f32 %v2265_v17, %v2848_v29  ;;  %2286 = vpow2.f32 %v1744_v33 }
 0x164   : > { %v2269_v18 = vpop.eup %2268  ;;  %1545 = vst.msk [vmem:[%s2546_s27 + $0x68] sm:$0xf] %vm1518_vm3, %v1871_v21  ;;  %v1869_v27 = vpack.c.bf16 %v1222_v5, %v1222_v5  ;;  %v1033_v54 = vadd.f32 1.0, %v2267_v20  ;;  %2288 = vpow2.f32 %v1776_v11 }
 0x165   : > { %v2271_v23 = vpop.eup %2270  ;;  %1577 = vst.msk [vmem:[%s2546_s27 + $0xe8] sm:$0xf] %vm1518_vm3, %v1903_v10  ;;  %v1901_v16 = vpack.c.bf16 %v1254_v63, %v1254_v63  ;;  %v1065_v7 = vadd.f32 1.0, %v2269_v18 }
 0x166   : > { %v2273_v51 = vpop.eup %2272  ;;  %1543 = vst.msk [vmem:[%s2546_s27 + $0x60] sm:$0xf] %vm1518_vm3, %v1869_v27  ;;  %2290 = vrcp.f32 %v1033_v54  ;;  %v1031_v59 = vadd.f32 1.0, %v2271_v23 }
 0x167   : > { %v2275_v25 = vpop.eup %2274  ;;  %1575 = vst.msk [vmem:[%s2546_s27 + $0xe0] sm:$0xf] %vm1518_vm3, %v1901_v16  ;;  %2292 = vrcp.f32 %v1065_v7  ;;  %v1063_v29 = vadd.f32 1.0, %v2273_v51 }
 0x168   : > { %v2277_v22 = vpop.eup %2276  ;;  %2294 = vrcp.f32 %v1031_v59  ;;  %v1036_v50 = vadd.f32 1.0, %v2275_v25 }
 0x169   : > { %v2279_v53 = vpop.eup %2278  ;;  %2296 = vrcp.f32 %v1063_v29  ;;  %v1068_v15 = vadd.f32 1.0, %v2277_v22 }
 0x16a   : > { %v2281_v14 = vpop.eup %2280  ;;  %2298 = vrcp.f32 %v1036_v50  ;;  %v1034_v28 = vadd.f32 1.0, %v2279_v53 }
 0x16b   : > { %v2283_v56 = vpop.eup %2282  ;;  %2300 = vrcp.f32 %v1068_v15  ;;  %v1066_v57 = vadd.f32 1.0, %v2281_v14 }
 0x16c   : > { %v2285_v30 = vpop.eup %2284  ;;  %2302 = vrcp.f32 %v1034_v28  ;;  %v1037_v31 = vadd.f32 1.0, %v2283_v56 }
 0x16d   : > { %v2287_v45 = vpop.eup %2286  ;;  %2304 = vrcp.f32 %v1066_v57  ;;  %v1069_v1 = vadd.f32 1.0, %v2285_v30 }
 0x16e   : > { %v2289_v19 = vpop.eup %2288  ;;  %2306 = vrcp.f32 %v1037_v31  ;;  %v1035_v3 = vadd.f32 1.0, %v2287_v45 }
 0x16f   : > { %2308 = vrcp.f32 %v1069_v1  ;;  %v1067_v61 = vadd.f32 1.0, %v2289_v19 }
 0x170   : > { %v2291_v40 = vpop.eup %2290  ;;  %2310 = vrcp.f32 %v1035_v3 }
 0x171   : > { %v2293_v36 = vpop.eup %2292  ;;  %v1225_v37 = vmul.f32 %v2291_v40, %v2884_v62  ;;  %2312 = vrcp.f32 %v1067_v61 }
 0x172   : > { %v2295_v34 = vpop.eup %2294  ;;  %v1257_v8 = vmul.f32 %v2293_v36, %v2887_v35 }
 0x173   : > { %v2297_v49 = vpop.eup %2296  ;;  %v1872_v43 = vpack.c.bf16 %v1225_v37, %v1225_v37  ;;  %v1223_v46 = vmul.f32 %v2295_v34, %v2890_v60 }
 0x174   : > { %v2299_v41 = vpop.eup %2298  ;;  %v1904_v42 = vpack.c.bf16 %v1257_v8, %v1257_v8  ;;  %v1255_v39 = vmul.f32 %v2297_v49, %v2893_v6 }
 0x175   : > { %v2301_v47 = vpop.eup %2300  ;;  %1546 = vst.msk [vmem:[%s2546_s27 + $0x6c] sm:$0xf] %vm1518_vm3, %v1872_v43  ;;  %v1870_v58 = vpack.c.bf16 %v1223_v46, %v1223_v46  ;;  %v1228_v62 = vmul.f32 %v2299_v41, %v2896_v4 }
 0x176   : > { %v2303_v33 = vpop.eup %2302  ;;  %1578 = vst.msk [vmem:[%s2546_s27 + $0xec] sm:$0xf] %vm1518_vm3, %v1904_v42  ;;  %v1902_v35 = vpack.c.bf16 %v1255_v39, %v1255_v39  ;;  %v1260_v52 = vmul.f32 %v2301_v47, %v2899_v44 }
 0x177   : > { %v2305_v60 = vpop.eup %2304  ;;  %1544 = vst.msk [vmem:[%s2546_s27 + $0x64] sm:$0xf] %vm1518_vm3, %v1870_v58  ;;  %v1875_v38 = vpack.c.bf16 %v1228_v62, %v1228_v62  ;;  %v1226_v6 = vmul.f32 %v2303_v33, %v2902_v12 }
 0x178   : > { %v2307_v32 = vpop.eup %2306  ;;  %1576 = vst.msk [vmem:[%s2546_s27 + $0xe4] sm:$0xf] %vm1518_vm3, %v1902_v35  ;;  %v1907_v11 = vpack.c.bf16 %v1260_v52, %v1260_v52  ;;  %v1258_v4 = vmul.f32 %v2305_v60, %v2905_v9 }
 0x179   : > { %v2309_v24 = vpop.eup %2308  ;;  %1549 = vst.msk [vmem:[%s2546_s27 + $0x78] sm:$0xf] %vm1518_vm3, %v1875_v38  ;;  %v1873_v44 = vpack.c.bf16 %v1226_v6, %v1226_v6  ;;  %v1229_v13 = vmul.f32 %v2307_v32, %v2919_v0 }
 0x17a   : > { %v2311_v2 = vpop.eup %2310  ;;  %1581 = vst.msk [vmem:[%s2546_s27 + $0xf8] sm:$0xf] %vm1518_vm3, %v1907_v11  ;;  %v1905_v12 = vpack.c.bf16 %v1258_v4, %v1258_v4  ;;  %v1261_v17 = vmul.f32 %v2309_v24, %v2923_v26 }
 0x17b   : > { %v2313_v21 = vpop.eup %2312  ;;  %1547 = vst.msk [vmem:[%s2546_s27 + $0x70] sm:$0xf] %vm1518_vm3, %v1873_v44  ;;  %v1876_v9 = vpack.c.bf16 %v1229_v13, %v1229_v13  ;;  %v1227_v5 = vmul.f32 %v2311_v2, %v2929_v48 }
 0x17c   : > { %1579 = vst.msk [vmem:[%s2546_s27 + $0xf0] sm:$0xf] %vm1518_vm3, %v1905_v12  ;;  %v1908_v20 = vpack.c.bf16 %v1261_v17, %v1261_v17  ;;  %v1259_v10 = vmul.f32 %v2313_v21, %v2935_v55 }
 0x17d   : > { %1550 = vst.msk [vmem:[%s2546_s27 + $0x7c] sm:$0xf] %vm1518_vm3, %v1876_v9  ;;  %v1874_v0 = vpack.c.bf16 %v1227_v5, %v1227_v5 }
 0x17e   : > { %1582 = vst.msk [vmem:[%s2546_s27 + $0xfc] sm:$0xf] %vm1518_vm3, %v1908_v20  ;;  %v1906_v63 = vpack.c.bf16 %v1259_v10, %v1259_v10 }
 0x17f   : > { %1548 = vst.msk [vmem:[%s2546_s27 + $0x74] sm:$0xf] %vm1518_vm3, %v1874_v0 }
 0x180   : > { %1580 = vst.msk [vmem:[%s2546_s27 + $0xf4] sm:$0xf] %vm1518_vm3, %v1906_v63 }
 0x181 PF: > { %s13_s12 = sadd.s32 1, %s2321_s12  }
 0x182   : > { %p10_p4 = scmp.ge.s32.totalorder %s13_s12, 6  }
 0x184   :  { %12 = sbr.rel (!%p10_p4) target bundleno = 1 (0x1), region = 62 }

</bundles_post_ra>
